<compile_context>
chip_gen: v7x
topology: tpu7x:2x2x1
jax: 0.10.0
libtpu: 0.0.40
codegen_flags: <defaults>
</compile_context>

<pallas_src>
import functools

import jax
import jax.numpy as jnp
from jax.experimental import pallas as pl
from jax.experimental.pallas import tpu as pltpu


def _round_up(x, m):
    return (x + m - 1) // m * m


def _dense_kernel(x_ref, w_ref, o_ref, acc_ref, *, activation):
    # x_ref: (tm, tk)   w_ref: (tk, tn)   o_ref: (tm, tn)   acc_ref: (tm, tn) f32
    @pl.when(pl.program_id(2) == 0)
    def _():
        acc_ref[...] = jnp.zeros_like(acc_ref)

    # Plain [tm, tk] @ [tk, tn] matmul on the MXU, f32 accumulation.
    acc_ref[...] += jnp.dot(
        x_ref[...], w_ref[...], preferred_element_type=jnp.float32
    )

    @pl.when(pl.program_id(2) == pl.num_programs(2) - 1)
    def _():
        y = acc_ref[...]
        if activation is not None:
            y = activation(y)  # elementwise, VPU/EUP
        o_ref[...] = y.astype(o_ref.dtype)


def vanilla_dense(x, weight, *, activation=jnp.tanh, tm=256, tn=256, tk=512):
    """y = activation(x @ weight.T); weight in PyTorch Linear layout [out, in]."""
    B, F_in = x.shape
    F_out, F_in_w = weight.shape
    assert F_in == F_in_w

    # One-time transpose so the kernel contracts LHS-last with RHS-first and
    # the output dim lands on the lane axis.
    wt = weight.T  # [F_in, F_out]

    # Shrink tiles for small problems so we don't pad a 16-row batch to 256,
    # while keeping (8, 128) alignment of block shapes.
    tm = min(tm, _round_up(B, 8))
    tn = min(tn, _round_up(F_out, 128))
    tk = min(tk, _round_up(F_in, 128))

    Bp = _round_up(B, tm)
    Kp = _round_up(F_in, tk)
    Np = _round_up(F_out, tn)

    x_p = x
    if (Bp, Kp) != (B, F_in):
        x_p = jnp.pad(x, ((0, Bp - B), (0, Kp - F_in)))
    wt_p = wt
    if (Kp, Np) != (F_in, F_out):
        wt_p = jnp.pad(wt, ((0, Kp - F_in), (0, Np - F_out)))

    grid = (Bp // tm, Np // tn, Kp // tk)

    itemsize = jnp.dtype(x.dtype).itemsize
    cost = pl.CostEstimate(
        flops=2 * B * F_in * F_out,
        transcendentals=(B * F_out) if activation is not None else 0,
        bytes_accessed=(B * F_in + F_in * F_out + B * F_out) * itemsize,
    )

    out_p = pl.pallas_call(
        functools.partial(_dense_kernel, activation=activation),
        out_shape=jax.ShapeDtypeStruct((Bp, Np), x.dtype),
        grid_spec=pltpu.PrefetchScalarGridSpec(
            num_scalar_prefetch=0,
            grid=grid,
            in_specs=[
                pl.BlockSpec((tm, tk), lambda i, j, k: (i, k)),
                pl.BlockSpec((tk, tn), lambda i, j, k: (k, j)),
            ],
            out_specs=pl.BlockSpec((tm, tn), lambda i, j, k: (i, j)),
            scratch_shapes=[pltpu.VMEM((tm, tn), jnp.float32)],
        ),
        compiler_params=pltpu.CompilerParams(
            dimension_semantics=("parallel", "parallel", "arbitrary")
        ),
        cost_estimate=cost,
    )(x_p, wt_p)

    # Strip padding (padded rows/cols are pure zeros and are discarded).
    return out_p[:B, :F_out]


if __name__ == "__main__":
    # Small shapes consistent with the module: dense layer over flat features.
    batch, input_size, output_size = 16, 32, 64

    key = jax.random.PRNGKey(0)
    k_x, k_w = jax.random.split(key)

    x = jax.random.normal(k_x, (batch, input_size), dtype=jnp.float32)
    # Deterministic init for nn.Linear(input_size, output_size, bias=False):
    # weight shape [output_size, input_size].
    bound = 1.0 / (input_size ** 0.5)
    weight = jax.random.uniform(
        k_w, (output_size, input_size),
        minval=-bound, maxval=bound, dtype=jnp.float32)

    y = vanilla_dense(x, weight)
    y = jax.block_until_ready(y)

    # Reference check (plain JAX)
    y_ref = jnp.tanh(x @ weight.T)
    assert y.shape == (batch, output_size)
    assert jnp.allclose(y, y_ref, atol=1e-5, rtol=1e-5)

    print("KERNEL_OK")
</pallas_src>

<mosaic_0001>
module attributes {stable_mosaic.version = 11 : i64} {
  func.func @_dense_kernel(%arg0: i32, %arg1: i32, %arg2: i32, %arg3: memref<16x128xf32, #tpu.memory_space<vmem>>, %arg4: memref<128x128xf32, #tpu.memory_space<vmem>>, %arg5: memref<16x128xf32, #tpu.memory_space<vmem>>, %arg6: memref<16x128xf32, #tpu.memory_space<vmem>>) attributes {dimension_semantics = [#tpu.dimension_semantics<parallel>, #tpu.dimension_semantics<parallel>, #tpu.dimension_semantics<arbitrary>], iteration_bounds = array<i64: 1, 1, 1>, scalar_prefetch = 0 : i64, scratch_operands = 1 : i64, tpu.core_type = #tpu.core_type<tc>, window_params = [{transform_indices = @transform_0, window_bounds = array<i64: 16, 128>}, {transform_indices = @transform_1, window_bounds = array<i64: 128, 128>}, {transform_indices = @transform_2, window_bounds = array<i64: 16, 128>}]} {
    %c0_i32 = arith.constant 0 : i32
    %0 = arith.cmpi eq, %arg2, %c0_i32 : i32
    %1 = arith.extui %0 : i1 to i32
    %c0_i32_0 = arith.constant 0 : i32
    %2 = arith.cmpi ne, %1, %c0_i32_0 : i32
    scf.if %2 {
      %cst_10 = arith.constant 0.000000e+00 : f32
      %12 = vector.broadcast %cst_10 : f32 to vector<16x128xf32>
      %c0_11 = arith.constant 0 : index
      %c0_12 = arith.constant 0 : index
      %13 = vector.load %arg6[%c0_11, %c0_12] : memref<16x128xf32, #tpu.memory_space<vmem>>, vector<16x128xf32>
      tpu.vector_store %arg6[%c0_11, %c0_12], %12 {strides = array<i32>} : memref<16x128xf32, #tpu.memory_space<vmem>>, vector<16x128xf32>,
    } else {
    }
    %c0 = arith.constant 0 : index
    %c0_1 = arith.constant 0 : index
    %3 = vector.load %arg6[%c0, %c0_1] : memref<16x128xf32, #tpu.memory_space<vmem>>, vector<16x128xf32>
    %c0_2 = arith.constant 0 : index
    %c0_3 = arith.constant 0 : index
    %4 = vector.load %arg3[%c0_2, %c0_3] : memref<16x128xf32, #tpu.memory_space<vmem>>, vector<16x128xf32>
    %c0_4 = arith.constant 0 : index
    %c0_5 = arith.constant 0 : index
    %5 = vector.load %arg4[%c0_4, %c0_5] : memref<128x128xf32, #tpu.memory_space<vmem>>, vector<128x128xf32>
    %cst = arith.constant dense<0.000000e+00> : vector<16x128xf32>
    %6 = tpu.matmul %4, %5, %cst {dimension_numbers = #tpu.dot_dimension_numbers<[1], [0], [0], [1], [0, 0, 1, 1], [], []>} : vector<16x128xf32>, vector<128x128xf32>, vector<16x128xf32> -> vector<16x128xf32>
    %7 = arith.addf %3, %6 : vector<16x128xf32>
    %c0_6 = arith.constant 0 : index
    %c0_7 = arith.constant 0 : index
    %8 = vector.load %arg6[%c0_6, %c0_7] : memref<16x128xf32, #tpu.memory_space<vmem>>, vector<16x128xf32>
    tpu.vector_store %arg6[%c0_6, %c0_7], %7 {strides = array<i32>} : memref<16x128xf32, #tpu.memory_space<vmem>>, vector<16x128xf32>,
    %c0_i32_8 = arith.constant 0 : i32
    %9 = arith.cmpi eq, %arg2, %c0_i32_8 : i32
    %10 = arith.extui %9 : i1 to i32
    %c0_i32_9 = arith.constant 0 : i32
    %11 = arith.cmpi ne, %10, %c0_i32_9 : i32
    scf.if %11 {
      %c0_10 = arith.constant 0 : index
      %c0_11 = arith.constant 0 : index
      %12 = vector.load %arg6[%c0_10, %c0_11] : memref<16x128xf32, #tpu.memory_space<vmem>>, vector<16x128xf32>
      %13 = math.tanh %12 : vector<16x128xf32>
      %c0_12 = arith.constant 0 : index
      %c0_13 = arith.constant 0 : index
      %14 = vector.load %arg5[%c0_12, %c0_13] : memref<16x128xf32, #tpu.memory_space<vmem>>, vector<16x128xf32>
      tpu.vector_store %arg5[%c0_12, %c0_13], %13 {strides = array<i32>} : memref<16x128xf32, #tpu.memory_space<vmem>>, vector<16x128xf32>,
    } else {
    }
    return
  }
  func.func @transform_0(%arg0: i32, %arg1: i32, %arg2: i32) -> (i32, i32) {
    %c0_i32 = arith.constant 0 : i32
    return %arg0, %arg2 : i32, i32
  }
  func.func @transform_1(%arg0: i32, %arg1: i32, %arg2: i32) -> (i32, i32) {
    %c0_i32 = arith.constant 0 : i32
    return %arg2, %arg1 : i32, i32
  }
  func.func @transform_2(%arg0: i32, %arg1: i32, %arg2: i32) -> (i32, i32) {
    %c0_i32 = arith.constant 0 : i32
    return %arg0, %arg1 : i32, i32
  }
}

</mosaic_0001>

<bundles_post_ra>
// kernel: tpu_custom_call.1
= control target key start
LH: loop header
LB: loop body
LE: loop exit
PB: predicated region body
PF: predicated region fallthrough
CT: control target
= control target key end

     0   :  { %7 = vsyncpa [#allocation4], 0  ;;  %s403_s0 = inlined_call_operand.hbm [shape: f32[16,128], index: 0, kind: input, shape index: {}]   ;;  %s404_s1 = inlined_call_operand.hbm [shape: f32[128,128], index: 1, kind: input, shape index: {}]   ;;  %s405_s2 = inlined_call_operand.hbm [shape: f32[16,128], index: 2, kind: output, shape index: {}]  }
   0x1   :  { %8 = vsyncpa [#allocation7], 0 }
   0x2   :  { %9 = vsyncpa [#allocation5], 0  ;;  %s338_s9 = smov [#allocation3]   ;;  %s266_s13 = scalar_lea.hbm %s403_s0, 256 }
   0x3   :  { %s15_s10 = sshll.u32 %s338_s9, 4  ;;  %p267_p0 = scmp.ne.s32.totalorder %s403_s0, %s266_s13  ;;  %s16_s10 = int_to_ptr.vmem [resolvable:$true] %s15_s10 }
   0x4   :  { %p270_p1 = scmp.lt.u32.totalorder %s266_s13, %s403_s0 }
   0x6   :  { %p272_p2 = pnand %p270_p1, %p267_p0 }
   0x8   :  { %275 = shalt.err (!%p272_p2)
}
   0x9   :  { %s276_s18 = scalar_lea.vmem %s16_s10, 256  ;;  %p281_p4 = scmp.lt.s32.totalorder %s16_s10, %s16_s10 }
   0xa   :  { %p277_p3 = scmp.ne.s32.totalorder %s16_s10, %s276_s18  ;;  %p282_p5 = scmp.lt.s32.totalorder %s276_s18, %s276_s18 }
   0xc   :  { %p283_p6 = por %p282_p5, %p281_p4 }
   0xe   :  { %p284_p7 = pnand %p283_p6, %p277_p3 }
  0x10   :  { %287 = shalt.err (!%p284_p7)
}
  0x11   :  { %s339_s19 = smov 128   ;;  %s340_s20 = smov 8  }
  0x12   :  { %21 = dma.hbm_to_vmem [thread:$0]  %s403_s0, 256, %s16_s10, [#allocation4], %s339_s19, %s339_s19, %s340_s20  }
  0x13   :  { %s341_s23 = smov [#allocation6]   ;;  %s288_s27 = scalar_lea.hbm %s404_s1, 2048 }
  0x14   :  { %s27_s24 = sshll.u32 %s341_s23, 4  ;;  %p289_p8 = scmp.ne.s32.totalorder %s404_s1, %s288_s27  ;;  %s28_s24 = int_to_ptr.vmem [resolvable:$true] %s27_s24 }
  0x15   :  { %p292_p9 = scmp.lt.u32.totalorder %s288_s27, %s404_s1 }
  0x17   :  { %p294_p10 = pnand %p292_p9, %p289_p8 }
  0x19   :  { %297 = shalt.err (!%p294_p10)
}
  0x1a   :  { %s298_s4 = scalar_lea.vmem %s28_s24, 2048  ;;  %p303_p12 = scmp.lt.s32.totalorder %s28_s24, %s28_s24 }
  0x1b   :  { %p299_p11 = scmp.ne.s32.totalorder %s28_s24, %s298_s4  ;;  %p304_p13 = scmp.lt.s32.totalorder %s298_s4, %s298_s4 }
  0x1d   :  { %p305_p0 = por %p304_p13, %p303_p12 }
  0x1f   :  { %p306_p1 = pnand %p305_p0, %p299_p11 }
  0x21   :  { %309 = shalt.err (!%p306_p1)
}
  0x22   :  { %33 = dma.hbm_to_vmem [thread:$0]  %s404_s1, 2048, %s28_s24, [#allocation7], %s339_s19, %s339_s19, %s340_s20  }
  0x23   :  { %332 = dma.done.wait [#allocation4], 256  }
  0x24   :  { %333 = vsyncadd [#allocation4], 4294967040 }
  0x25   :  { %334 = dma.done.wait [#allocation7], 2048  }
  0x26   :  { %335 = vsyncadd [#allocation7], 4294965248  ;;  %v50_v0 = vld [vmem:[#allocation6] sm:$0xff]  ;;  %v51_v1 = vld [vmem:[#allocation6 + $0x8] sm:$0xff]  ;;  %s342_s1 = smov [#allocation8]  }
  0x27   :  { %v52_v2 = vld [vmem:[#allocation6 + $0x10] sm:$0xff]  ;;  %v225_v3 = vpack.c.bf16 %v51_v1, %v50_v0  ;;  %v53_v4 = vld [vmem:[#allocation6 + $0x18] sm:$0xff]  ;;  %v54_v6 = vld [vmem:[#allocation6 + $0x20] sm:$0xff]  ;;  %s159_s6 = sshll.u32 %s342_s1, 4  ;;  %s160_s6 = int_to_ptr.vmem [resolvable:$true] %s159_s6 }
  0x28   :  { %v229_v5 = vpack.c.bf16 %v53_v4, %v52_v2  ;;  %v55_v7 = vld [vmem:[#allocation6 + $0x28] sm:$0xff]  ;;  %v48_v9 = vld [vmem:[#allocation3] sm:$0xff]  ;;  %v57_v11 = vld [vmem:[#allocation6 + $0x38] sm:$0xff]  ;;  %s310_s7 = scalar_lea.vmem %s160_s6, 256  ;;  %p315_p3 = scmp.lt.s32.totalorder %s160_s6, %s160_s6 }
  0x29   :  { %226 = vmatprep.subr.bf16.mxu0 %v225_v3  ;;  %v233_v8 = vpack.c.bf16 %v55_v7, %v54_v6  ;;  %v56_v10 = vld [vmem:[#allocation6 + $0x30] sm:$0xff]  ;;  %222 = vmatprep.mubr.f32.mxu0 %v48_v9  ;;  %v58_v13 = vld [vmem:[#allocation6 + $0x40] sm:$0xff]  ;;  %v59_v14 = vld [vmem:[#allocation6 + $0x48] sm:$0xff]  ;;  %p311_p2 = scmp.ne.s32.totalorder %s160_s6, %s310_s7  ;;  %p316_p4 = scmp.lt.s32.totalorder %s310_s7, %s310_s7 }
  0x2a   :  { %228 = vmatpush3.bf16.msra.mxu0 %v225_v3  ;;  %v237_v12 = vpack.c.bf16 %v57_v11, %v56_v10  ;;  %v241_v15 = vpack.c.bf16 %v59_v14, %v58_v13  ;;  %v60_v16 = vld [vmem:[#allocation6 + $0x50] sm:$0xff]  ;;  %v61_v17 = vld [vmem:[#allocation6 + $0x58] sm:$0xff]  ;;  %v62_v19 = vld [vmem:[#allocation6 + $0x60] sm:$0xff] }
  0x2b   :  { %230 = vmatprep.subr.bf16.mxu0 %v229_v5  ;;  %v245_v18 = vpack.c.bf16 %v61_v17, %v60_v16  ;;  %v63_v20 = vld [vmem:[#allocation6 + $0x68] sm:$0xff]  ;;  %v64_v22 = vld [vmem:[#allocation6 + $0x70] sm:$0xff]  ;;  %v65_v23 = vld [vmem:[#allocation6 + $0x78] sm:$0xff]  ;;  %p317_p5 = por %p316_p4, %p315_p3 }
  0x2c   :  { %v249_v21 = vpack.c.bf16 %v63_v20, %v62_v19  ;;  %v253_v24 = vpack.c.bf16 %v65_v23, %v64_v22  ;;  %v49_v25 = vld [vmem:[#allocation3 + $0x8] sm:$0xff] }
  0x2d   :  { %p318_p6 = pnand %p317_p5, %p311_p2 }
  0x2e   :  { %232 = vmatpush3.bf16.msra.mxu0 %v229_v5 }
  0x2f   :  { %234 = vmatprep.subr.bf16.mxu0 %v233_v8 }
  0x32   :  { %236 = vmatpush3.bf16.msra.mxu0 %v233_v8 }
  0x33   :  { %238 = vmatprep.subr.bf16.mxu0 %v237_v12 }
  0x36   :  { %240 = vmatpush3.bf16.msra.mxu0 %v237_v12 }
  0x37   :  { %242 = vmatprep.subr.bf16.mxu0 %v241_v15 }
  0x3a   :  { %244 = vmatpush3.bf16.msra.mxu0 %v241_v15 }
  0x3b   :  { %246 = vmatprep.subr.bf16.mxu0 %v245_v18 }
  0x3e   :  { %248 = vmatpush3.bf16.msra.mxu0 %v245_v18 }
  0x3f   :  { %250 = vmatprep.subr.bf16.mxu0 %v249_v21 }
  0x42   :  { %252 = vmatpush3.bf16.msra.mxu0 %v249_v21 }
  0x43   :  { %254 = vmatprep.subr.bf16.mxu0 %v253_v24 }
  0x46   :  { %256 = vmatpush3.bf16.msra.mxu0 %v253_v24 }
  0x49   :  { %223 = vmatmul.mubr.f32.vlgmr.msra.gmra.mrb[0].mxu0 %v49_v25 }
 0x11c   :  { %v224_v26 = vpop.f32.mrb[0].mxu0 }
 0x11d   :  { %262 = vtanh.f32 %v224_v26  ;;  %v132_v27 = vpop.f32.mrb[1].mxu0 }
 0x11e   :  { %264 = vtanh.f32 %v132_v27 }
 0x127   :  { %v263_v28 = vpop.eup %262 }
 0x128   :  { %v265_v29 = vpop.eup %264  ;;  %153 = vst [vmem:[#allocation8 + $0x8] sm:$0xff] %v263_v28 }
 0x129   :  { %152 = vst [vmem:[#allocation8] sm:$0xff] %v265_v29 }
 0x12a   :  { %321 = shalt.err (!%p318_p6)
}
 0x12b   :  { %s322_s10 = scalar_lea.hbm %s405_s2, 256 }
 0x12c   :  { %p323_p7 = scmp.ne.s32.totalorder %s405_s2, %s322_s10  ;;  %p326_p8 = scmp.lt.u32.totalorder %s322_s10, %s405_s2 }
 0x12e   :  { %p328_p9 = pnand %p326_p8, %p323_p7 }
 0x130   :  { %331 = shalt.err (!%p328_p9)
}
 0x131   :  { %165 = dma.vmem_to_hbm [thread:$0]  %s160_s6, 256, %s405_s2, [#allocation5], %s339_s19, %s339_s19, %s340_s20  }
 0x132   :  { %336 = dma.done.wait [#allocation5], 256  }
 0x133   :  { %337 = vsyncadd [#allocation5], 4294967040 }
 0x134   :  { %169 = vsyncpa [#allocation4], 1 }
 0x135   :  { %170 = vsyncpa [#allocation7], 1 }
 0x136   :  { %171 = vsyncpa [#allocation5], 1 }

</bundles_post_ra>
